<compile_context>
chip_gen: v7x
topology: tpu7x:2x2x1
jax: 0.10.0
libtpu: 0.0.40
codegen_flags: <defaults>
</compile_context>

<pallas_src>
import jax
import jax.numpy as jnp
from jax.experimental import pallas as pl
from jax.experimental.pallas import tpu as pltpu


# ----------------------------- kernels --------------------------------------


def _vector_linear_bias_kernel(x_ref, w_ref, b_ref, o_ref):
    # x_ref: (tb, tn); w_ref/b_ref: (1, tn).
    # The VPU sublane-broadcasts the (1, tn) operands across the tb rows;
    # no explicit broadcast_in_dim is materialized.
    o_ref[...] = x_ref[...] * w_ref[...] + b_ref[...]


def _vector_linear_nobias_kernel(x_ref, w_ref, o_ref):
    o_ref[...] = x_ref[...] * w_ref[...]


# --------------------------- tile selection ----------------------------------


def _sublane_pack(dtype) -> int:
    """Rows packed per 32-bit sublane for this dtype."""
    return {4: 8, 2: 16, 1: 32}.get(jnp.dtype(dtype).itemsize, 8)


def _vmem_capacity_bytes() -> int:
    try:
        return int(pltpu.get_tpu_info().vmem_capacity_bytes)
    except Exception:
        # Conservative fallback: v7x per-TensorCore VMEM (smallest of the fleet).
        return 64 * 1024 * 1024


def _choose_tiles(B, N, x_dtype, o_dtype):
    """Pick (tb, tn) from an explicit VMEM budget."""
    pack = _sublane_pack(x_dtype)
    vmem_cap = _vmem_capacity_bytes()
    # Budget for the double-buffered x + out working set; leave headroom for
    # params, compiler scratch, and (on v7x) the other TensorCore.
    ws_budget = min(vmem_cap // 3, 32 << 20)
    bytes_per_elem = jnp.dtype(x_dtype).itemsize + jnp.dtype(o_dtype).itemsize
    elem_budget = max(pack * 128, ws_budget // (2 * bytes_per_elem))

    # Lane tile: keep the full N when it fits (maximally lane-dense stores);
    # only tile N when it is a multiple of 128 (tiling rule) and too large.
    if N % 128 != 0 or N * pack <= elem_budget:
        tn = N
    else:
        tn = min(N, max(128, min(4096, ((elem_budget // pack) // 128) * 128)))

    # Row tile: as many rows as the budget allows, multiple of the sublane pack.
    tb_cap = max(pack, ((elem_budget // tn) // pack) * pack)
    tb = B if B <= tb_cap else tb_cap
    return tb, tn


def _legalize_tiles(tb, tn, B, N):
    """Enforce the (8, 128) block-shape rule when a tile is smaller than the dim."""
    if tb < B and tb % 8 != 0:
        tb = max(8, (tb // 8) * 8)
    if tn < N and tn % 128 != 0:
        tn = max(128, (tn // 128) * 128)
    return min(tb, B), min(tn, N)


# ------------------------------ wrapper --------------------------------------


def vector_linear(x, weight, bias=None, *, tb=None, tn=None):
    """Pallas implementation of VectorLinear.forward.

    x:      [..., N]  (leading dims are flattened into the batch axis)
    weight: [1, N]
    bias:   [1, N] or None (keep_bias=False)
    tb, tn: optional tile overrides (auto-sized from the VMEM budget if None).
    """
    orig_shape = x.shape
    N = orig_shape[-1]
    assert weight.shape == (1, N), f"weight must be (1, {N}), got {weight.shape}"
    if bias is not None:
        assert bias.shape == (1, N), f"bias must be (1, {N}), got {bias.shape}"

    x2 = x.reshape(-1, N)
    B = x2.shape[0]
    out_dtype = x2.dtype

    auto_tb, auto_tn = _choose_tiles(B, N, x2.dtype, out_dtype)
    tb = auto_tb if tb is None else min(tb, B)
    tn = auto_tn if tn is None else min(tn, N)
    tb, tn = _legalize_tiles(tb, tn, B, N)

    grid = (pl.cdiv(B, tb), pl.cdiv(N, tn))

    x_spec = pl.BlockSpec((tb, tn), lambda i, j: (i, j))
    # weight/bias: constant row index -> stay VMEM-resident across batch tiles.
    p_spec = pl.BlockSpec((1, tn), lambda i, j: (0, j))
    o_spec = pl.BlockSpec((tb, tn), lambda i, j: (i, j))

    # Explicit VMEM budget: double-buffered x + out tiles, params, headroom.
    x_bytes = tb * tn * jnp.dtype(x2.dtype).itemsize
    o_bytes = tb * tn * jnp.dtype(out_dtype).itemsize
    p_bytes = tn * jnp.dtype(weight.dtype).itemsize * (2 if bias is not None else 1)
    vmem_limit = min(
        _vmem_capacity_bytes(),
        max(32 << 20, 2 * (x_bytes + o_bytes) + 4 * p_bytes + (8 << 20)),
    )

    compiler_params = pltpu.CompilerParams(
        dimension_semantics=("parallel", "parallel"),
        vmem_limit_bytes=int(vmem_limit),
    )

    if bias is not None:
        kernel = _vector_linear_bias_kernel
        in_specs = [x_spec, p_spec, p_spec]
        args = (x2, weight, bias)
    else:
        kernel = _vector_linear_nobias_kernel
        in_specs = [x_spec, p_spec]
        args = (x2, weight)

    out = pl.pallas_call(
        kernel,
        out_shape=jax.ShapeDtypeStruct((B, N), out_dtype),
        grid_spec=pltpu.PrefetchScalarGridSpec(
            num_scalar_prefetch=0,
            grid=grid,
            in_specs=in_specs,
            out_specs=o_spec,
        ),
        compiler_params=compiler_params,
    )(*args)

    return out.reshape(orig_shape)


# -------------------------------- demo ---------------------------------------


if __name__ == "__main__":
    key = jax.random.PRNGKey(0)
    kx, kw, kb, kx2 = jax.random.split(key, 4)

    # Small demo consistent with the module: batch=8, N=128.
    B, N = 8, 128
    x = jax.random.normal(kx, (B, N), dtype=jnp.float32)
    # reset_parameters(): normal init with std=0.01
    weight = 0.01 * jax.random.normal(kw, (1, N), dtype=jnp.float32)
    bias = 0.01 * jax.random.normal(kb, (1, N), dtype=jnp.float32)

    out = vector_linear(x, weight, bias)
    jax.block_until_ready(out)
    assert jnp.allclose(out, x * weight + bias, atol=1e-6), "mismatch vs reference"

    # keep_bias=False path.
    out_nb = vector_linear(x, weight, None)
    jax.block_until_ready(out_nb)
    assert jnp.allclose(out_nb, x * weight, atol=1e-6), "mismatch (no bias)"

    # Exercise the 2-D grid / partial-tile path with forced small tiles
    # (B not a multiple of 8, N a multiple of 128 but tiled).
    B2, N2 = 20, 384
    x2 = jax.random.normal(kx2, (B2, N2), dtype=jnp.float32)
    w2 = 0.01 * jax.random.normal(kw, (1, N2), dtype=jnp.float32)
    b2 = 0.01 * jax.random.normal(kb, (1, N2), dtype=jnp.float32)
    out2 = vector_linear(x2, w2, b2, tb=8, tn=128)
    jax.block_until_ready(out2)
    assert jnp.allclose(out2, x2 * w2 + b2, atol=1e-6), "mismatch (tiled grid)"

    print("KERNEL_OK")
</pallas_src>

<mosaic_0001>
module attributes {stable_mosaic.version = 11 : i64} {
  func.func @_vector_linear_bias_kernel(%arg0: i32, %arg1: i32, %arg2: memref<8x128xf32, #tpu.memory_space<vmem>>, %arg3: memref<1x128xf32, #tpu.memory_space<vmem>>, %arg4: memref<1x128xf32, #tpu.memory_space<vmem>>, %arg5: memref<8x128xf32, #tpu.memory_space<vmem>>) attributes {dimension_semantics = [#tpu.dimension_semantics<parallel>, #tpu.dimension_semantics<parallel>], iteration_bounds = array<i64: 1, 1>, scalar_prefetch = 0 : i64, scratch_operands = 0 : i64, tpu.core_type = #tpu.core_type<tc>, window_params = [{transform_indices = @transform_0, window_bounds = array<i64: 8, 128>}, {transform_indices = @transform_1, window_bounds = array<i64: 1, 128>}, {transform_indices = @transform_2, window_bounds = array<i64: 1, 128>}, {transform_indices = @transform_3, window_bounds = array<i64: 8, 128>}]} {
    %c0 = arith.constant 0 : index
    %c0_0 = arith.constant 0 : index
    %0 = vector.load %arg2[%c0, %c0_0] : memref<8x128xf32, #tpu.memory_space<vmem>>, vector<8x128xf32>
    %c0_1 = arith.constant 0 : index
    %c0_2 = arith.constant 0 : index
    %1 = vector.load %arg3[%c0_1, %c0_2] : memref<1x128xf32, #tpu.memory_space<vmem>>, vector<1x128xf32>
    %2 = vector.broadcast %1 : vector<1x128xf32> to vector<8x128xf32>
    %3 = arith.mulf %0, %2 : vector<8x128xf32>
    %c0_3 = arith.constant 0 : index
    %c0_4 = arith.constant 0 : index
    %4 = vector.load %arg4[%c0_3, %c0_4] : memref<1x128xf32, #tpu.memory_space<vmem>>, vector<1x128xf32>
    %5 = vector.broadcast %4 : vector<1x128xf32> to vector<8x128xf32>
    %6 = arith.addf %3, %5 : vector<8x128xf32>
    %c0_5 = arith.constant 0 : index
    %c0_6 = arith.constant 0 : index
    %7 = vector.load %arg5[%c0_5, %c0_6] : memref<8x128xf32, #tpu.memory_space<vmem>>, vector<8x128xf32>
    tpu.vector_store %arg5[%c0_5, %c0_6], %6 {strides = array<i32>} : memref<8x128xf32, #tpu.memory_space<vmem>>, vector<8x128xf32>,
    return
  }
  func.func @transform_0(%arg0: i32, %arg1: i32) -> (i32, i32) {
    %c0_i32 = arith.constant 0 : i32
    return %arg0, %arg1 : i32, i32
  }
  func.func @transform_1(%arg0: i32, %arg1: i32) -> (i32, i32) {
    %c0_i32 = arith.constant 0 : i32
    %c0_i32_0 = arith.constant 0 : i32
    return %c0_i32, %arg1 : i32, i32
  }
  func.func @transform_2(%arg0: i32, %arg1: i32) -> (i32, i32) {
    %c0_i32 = arith.constant 0 : i32
    %c0_i32_0 = arith.constant 0 : i32
    return %c0_i32, %arg1 : i32, i32
  }
  func.func @transform_3(%arg0: i32, %arg1: i32) -> (i32, i32) {
    %c0_i32 = arith.constant 0 : i32
    return %arg0, %arg1 : i32, i32
  }
}

</mosaic_0001>

<bundles_post_ra>
// kernel: tpu_custom_call.1
= control target key start
LH: loop header
LB: loop body
LE: loop exit
PB: predicated region body
PF: predicated region fallthrough
CT: control target
= control target key end

     0   :  { %8 = vsyncpa [#allocation3], 0  ;;  %s164_s0 = inlined_call_operand.hbm [shape: f32[8,128], index: 0, kind: input, shape index: {}]   ;;  %s165_s1 = inlined_call_operand.vmem [shape: f32[1,128], index: 1, kind: input, shape index: {}]   ;;  %s166_s2 = inlined_call_operand.vmem [shape: f32[1,128], index: 2, kind: input, shape index: {}]   ;;  %s167_s3 = inlined_call_operand.hbm [shape: f32[8,128], index: 3, kind: output, shape index: {}]  }
   0x1   :  { %9 = vsyncpa [#allocation4], 0  ;;  %s112_s12 = smov [#allocation2]   ;;  %s64_s16 = scalar_lea.hbm %s164_s0, 128 }
   0x2   :  { %s16_s13 = sshll.u32 %s112_s12, 4  ;;  %p65_p0 = scmp.ne.s32.totalorder %s164_s0, %s64_s16  ;;  %s17_s13 = int_to_ptr.vmem [resolvable:$true] %s16_s13 }
   0x3   :  { %p68_p1 = scmp.lt.u32.totalorder %s64_s16, %s164_s0 }
   0x5   :  { %p70_p2 = pnand %p68_p1, %p65_p0 }
   0x7   :  { %73 = shalt.err (!%p70_p2)
}
   0x8   :  { %s74_s21 = scalar_lea.vmem %s17_s13, 128  ;;  %p79_p4 = scmp.lt.s32.totalorder %s17_s13, %s17_s13 }
   0x9   :  { %p75_p3 = scmp.ne.s32.totalorder %s17_s13, %s74_s21  ;;  %p80_p5 = scmp.lt.s32.totalorder %s74_s21, %s74_s21 }
   0xb   :  { %p81_p6 = por %p80_p5, %p79_p4 }
   0xd   :  { %p82_p7 = pnand %p81_p6, %p75_p3 }
   0xf   :  { %85 = shalt.err (!%p82_p7)
}
  0x10   :  { %19 = dma.hbm_to_vmem [thread:$0]  %s164_s0, 128, %s17_s13, [#allocation3]  }
  0x11   :  { %108 = dma.done.wait [#allocation3], 128  }
  0x12   :  { %109 = vsyncadd [#allocation3], 4294967168  ;;  %v27_v0 = vld [vmem:[#allocation2] sm:$0xff]  ;;  %s113_s28 = smov [#allocation5]  }
  0x13   :  { %v60_v1 = vld [vmem:[%s165_s1] ss:$0 sm:$0xff]  ;;  %s51_s29 = sshll.u32 %s113_s28, 4  ;;  %s52_s29 = int_to_ptr.vmem [resolvable:$true] %s51_s29 }
  0x14   :  { %v61_v2 = vld [vmem:[%s166_s2] ss:$0 sm:$0xff]  ;;  %v35_v3 = vmul.f32 %v60_v1, %v27_v0  ;;  %s86_s30 = scalar_lea.vmem %s52_s29, 128  ;;  %p91_p9 = scmp.lt.s32.totalorder %s52_s29, %s52_s29 }
  0x15   :  { %p87_p8 = scmp.ne.s32.totalorder %s52_s29, %s86_s30  ;;  %p92_p10 = scmp.lt.s32.totalorder %s86_s30, %s86_s30 }
  0x16   :  { %v43_v4 = vadd.f32 %v61_v2, %v35_v3 }
  0x17   :  { %p93_p11 = por %p92_p10, %p91_p9 }
  0x18   :  { %44 = vst [vmem:[#allocation5] sm:$0xff] %v43_v4 }
  0x19   :  { %p94_p12 = pnand %p93_p11, %p87_p8 }
  0x1b   :  { %97 = shalt.err (!%p94_p12)
}
  0x1c   :  { %s98_s1 = scalar_lea.hbm %s167_s3, 128 }
  0x1d   :  { %p99_p13 = scmp.ne.s32.totalorder %s167_s3, %s98_s1  ;;  %p102_p0 = scmp.lt.u32.totalorder %s98_s1, %s167_s3 }
  0x1f   :  { %p104_p1 = pnand %p102_p0, %p99_p13 }
  0x21   :  { %107 = shalt.err (!%p104_p1)
}
  0x22   :  { %54 = dma.vmem_to_hbm [thread:$0]  %s52_s29, 128, %s167_s3, [#allocation4]  }
  0x23   :  { %110 = dma.done.wait [#allocation4], 128  }
  0x24   :  { %111 = vsyncadd [#allocation4], 4294967168 }
  0x25   :  { %58 = vsyncpa [#allocation3], 1 }
  0x26   :  { %59 = vsyncpa [#allocation4], 1 }

</bundles_post_ra>
